<compile_context>
chip_gen: v7x
topology: tpu7x:2x2x1
jax: 0.10.0
libtpu: 0.0.40
codegen_flags: <defaults>
</compile_context>

<pallas_src>
import jax
import jax.numpy as jnp
from jax.experimental import pallas as pl
from jax.experimental.pallas import tpu as pltpu

VOCAB = 64    # vocab_size
EMBED = 16    # embed_dim
HIDDEN = 32   # hidden_units
BATCH = 2
PACKED = VOCAB + 2 * HIDDEN   # 64 + 32 + 32 = 128 lanes -> exactly one vreg wide


def lstm_decoder_kernel(x_ref, h0_ref, c0_ref,
                        w_cat_ref, b_ref, w_fc_ref, b_fc_ref,
                        out_ref,
                        h_scr, c_scr):
    """One LSTM decode step per grid iteration; state carried in VMEM scratch.

    x_ref    : (1, Bp, E)      embedded token for step t (dropout in eval mode = identity)
    h0_ref   : (Bp, H)         initial hidden state (read only at t == 0)
    c0_ref   : (Bp, H)         initial cell state   (read only at t == 0)
    w_cat_ref: (E+H, 4H)       [W_ih[:, :E] ; W_hh]^T  (fused gate weights)
    b_ref    : (1, 4H)         b_ih + b_hh
    w_fc_ref : (H, V)          fc weights, pre-transposed
    b_fc_ref : (1, V)          fc bias
    out_ref  : (1, Bp, 128)    packed [logits | h_new | c_new]
    h_scr/c_scr : (Bp, H)      carried state
    """
    H = HIDDEN
    t = pl.program_id(0)

    @pl.when(t == 0)
    def _():
        h_scr[...] = h0_ref[...]
        c_scr[...] = c0_ref[...]

    h = h_scr[...]
    c = c_scr[...]

    # Build [x | h] in registers so the two gate matmuls become a single MXU push.
    xh = jnp.concatenate([x_ref[0], h], axis=-1)              # (Bp, E+H)

    # gates = [x|h] @ [W_ih^T ; W_hh^T] + (b_ih + b_hh); PyTorch gate order (i, f, g, o)
    gates = (jnp.dot(xh, w_cat_ref[...], preferred_element_type=jnp.float32)
             + b_ref[...])                                    # (Bp, 4H = 128)

    # Full 128-lane transcendentals (same EUP cost as a quarter-width op),
    # then take the quarter segments.
    sig = jax.nn.sigmoid(gates)
    th = jnp.tanh(gates)

    i_g = sig[:, 0 * H:1 * H]
    f_g = sig[:, 1 * H:2 * H]
    g_g = th[:, 2 * H:3 * H]
    o_g = sig[:, 3 * H:4 * H]

    c_new = f_g * c + i_g * g_g
    h_new = o_g * jnp.tanh(c_new)

    h_scr[...] = h_new
    c_scr[...] = c_new

    # fc: logits = h_new @ W_fc^T + b_fc
    logits = (jnp.dot(h_new, w_fc_ref[...], preferred_element_type=jnp.float32)
              + b_fc_ref[...])                                # (Bp, V)

    # Pack into one 128-lane-wide slab -> single unmasked full-width store,
    # single lane-dense writeback DMA.
    out_ref[0] = jnp.concatenate([logits, h_new, c_new], axis=-1)


def init_params(key):
    """Deterministic parameter init mirroring nn.Embedding / nn.LSTM / nn.Linear shapes."""
    ks = jax.random.split(key, 7)
    k_lstm = 1.0 / jnp.sqrt(HIDDEN)
    k_fc = 1.0 / jnp.sqrt(HIDDEN)

    emb = jax.random.normal(ks[0], (VOCAB, EMBED), jnp.float32)
    emb = emb.at[0].set(0.0)  # padding_idx=0

    params = {
        "embedding": emb,
        # nn.LSTM(input_size = 2*H + E, hidden_size = H, num_layers = 1)
        "weight_ih": jax.random.uniform(ks[1], (4 * HIDDEN, 2 * HIDDEN + EMBED),
                                        jnp.float32, -k_lstm, k_lstm),
        "weight_hh": jax.random.uniform(ks[2], (4 * HIDDEN, HIDDEN),
                                        jnp.float32, -k_lstm, k_lstm),
        "bias_ih": jax.random.uniform(ks[3], (4 * HIDDEN,), jnp.float32, -k_lstm, k_lstm),
        "bias_hh": jax.random.uniform(ks[4], (4 * HIDDEN,), jnp.float32, -k_lstm, k_lstm),
        # nn.Linear(hidden_units, vocab_size)
        "fc_w": jax.random.uniform(ks[5], (VOCAB, HIDDEN), jnp.float32, -k_fc, k_fc),
        "fc_b": jax.random.uniform(ks[6], (VOCAB,), jnp.float32, -k_fc, k_fc),
    }
    return params


def prep_params(params):
    """One-time weight preprocessing (hoisted out of the per-step forward).

    TODO(synk): the module declares LSTM input_size = 2*hidden + embed_dim but its
    forward only feeds the embed_dim-sized embedding; we use the first E columns of
    weight_ih (mathematically identical to zero-padding the input to 2*H + E).
    """
    w_ih_e = params["weight_ih"][:, :EMBED]                            # (4H, E)
    w_cat = jnp.concatenate([w_ih_e, params["weight_hh"]], axis=1).T   # (E+H, 4H)
    return {
        "embedding": params["embedding"],
        "w_cat": w_cat,
        "b": (params["bias_ih"] + params["bias_hh"])[None, :],         # (1, 4H)
        "w_fc_t": params["fc_w"].T,                                    # (H, V)
        "b_fc": params["fc_b"][None, :],                               # (1, V)
    }


def lstm_decoder_forward(prepped, x_tokens, h_c):
    """x_tokens: int32 (B,) ; h_c = (h0, c0) each (num_layers=1, B, H)."""
    h0, c0 = h_c
    B = x_tokens.shape[0]
    Bp = ((B + 7) // 8) * 8                                 # pad batch to full sublanes

    # Glue: embedding gather + eval-mode dropout (identity), pad batch rows.
    emb = prepped["embedding"][x_tokens]                    # (B, E)
    emb_seq = jnp.zeros((1, Bp, EMBED), jnp.float32).at[0, :B].set(emb)   # (T=1, Bp, E)
    h0p = jnp.zeros((Bp, HIDDEN), jnp.float32).at[:B].set(h0[0])
    c0p = jnp.zeros((Bp, HIDDEN), jnp.float32).at[:B].set(c0[0])

    T = emb_seq.shape[0]

    packed = pl.pallas_call(
        lstm_decoder_kernel,
        out_shape=jax.ShapeDtypeStruct((T, Bp, PACKED), jnp.float32),
        grid_spec=pltpu.PrefetchScalarGridSpec(
            num_scalar_prefetch=0,
            grid=(T,),
            in_specs=[
                pl.BlockSpec((1, Bp, EMBED), lambda t: (t, 0, 0)),             # embedded tokens
                pl.BlockSpec((Bp, HIDDEN), lambda t: (0, 0)),                  # h0 (resident)
                pl.BlockSpec((Bp, HIDDEN), lambda t: (0, 0)),                  # c0 (resident)
                pl.BlockSpec((EMBED + HIDDEN, 4 * HIDDEN), lambda t: (0, 0)),  # fused gate W
                pl.BlockSpec((1, 4 * HIDDEN), lambda t: (0, 0)),               # fused gate bias
                pl.BlockSpec((HIDDEN, VOCAB), lambda t: (0, 0)),               # fc W^T
                pl.BlockSpec((1, VOCAB), lambda t: (0, 0)),                    # fc bias
            ],
            out_specs=pl.BlockSpec((1, Bp, PACKED), lambda t: (t, 0, 0)),
            scratch_shapes=[
                pltpu.VMEM((Bp, HIDDEN), jnp.float32),          # h carry
                pltpu.VMEM((Bp, HIDDEN), jnp.float32),          # c carry
            ],
        ),
        compiler_params=pltpu.CompilerParams(
            dimension_semantics=("arbitrary",)),                # sequential carry over time
    )(emb_seq, h0p, c0p, prepped["w_cat"], prepped["b"],
      prepped["w_fc_t"], prepped["b_fc"])

    logits = packed[:, :B, :VOCAB]                          # (T, B, V)
    h_last = packed[T - 1, :B, VOCAB:VOCAB + HIDDEN]        # (B, H)
    c_last = packed[T - 1, :B, VOCAB + HIDDEN:]             # (B, H)

    output = jnp.transpose(logits, (1, 0, 2))               # (B, T=1, V) == fc(lstm_out)
    return output, (h_last[None, ...], c_last[None, ...])   # ((1,B,H), (1,B,H))


def reference_forward(params, x_tokens, h_c):
    """Pure-JAX reference of the module forward (eval-mode dropout = identity)."""
    h0, c0 = h_c
    emb = params["embedding"][x_tokens]                     # (B, E)
    w_ih_e = params["weight_ih"][:, :EMBED]                 # (4H, E)
    gates = (emb @ w_ih_e.T + h0[0] @ params["weight_hh"].T
             + params["bias_ih"] + params["bias_hh"])       # (B, 4H)
    i_g, f_g, g_g, o_g = jnp.split(gates, 4, axis=-1)
    i_g = jax.nn.sigmoid(i_g)
    f_g = jax.nn.sigmoid(f_g)
    g_g = jnp.tanh(g_g)
    o_g = jax.nn.sigmoid(o_g)
    c_new = f_g * c0[0] + i_g * g_g
    h_new = o_g * jnp.tanh(c_new)
    logits = h_new @ params["fc_w"].T + params["fc_b"]
    return logits[:, None, :], (h_new[None, ...], c_new[None, ...])


if __name__ == "__main__":
    key = jax.random.PRNGKey(0)
    k_p, k_x, k_h, k_c = jax.random.split(key, 4)

    params = init_params(k_p)
    prepped = prep_params(params)   # hoisted one-time weight prep

    x_tokens = jax.random.randint(k_x, (BATCH,), 0, VOCAB, dtype=jnp.int32)
    h0 = jax.random.normal(k_h, (1, BATCH, HIDDEN), jnp.float32)
    c0 = jax.random.normal(k_c, (1, BATCH, HIDDEN), jnp.float32)

    output, (ht, ct) = lstm_decoder_forward(prepped, x_tokens, (h0, c0))
    jax.block_until_ready((output, ht, ct))

    assert output.shape == (BATCH, 1, VOCAB)
    assert ht.shape == (1, BATCH, HIDDEN)
    assert ct.shape == (1, BATCH, HIDDEN)

    ref_out, (ref_ht, ref_ct) = reference_forward(params, x_tokens, (h0, c0))
    assert bool(jnp.allclose(output, ref_out, atol=1e-5, rtol=1e-5))
    assert bool(jnp.allclose(ht, ref_ht, atol=1e-5, rtol=1e-5))
    assert bool(jnp.allclose(ct, ref_ct, atol=1e-5, rtol=1e-5))
    assert bool(jnp.all(jnp.isfinite(output)))

    print("KERNEL_OK")
</pallas_src>

<mosaic_0001>
module attributes {stable_mosaic.version = 11 : i64} {
  func.func @lstm_decoder_kernel(%arg0: i32, %arg1: memref<1x8x16xf32, #tpu.memory_space<vmem>>, %arg2: memref<8x32xf32, #tpu.memory_space<vmem>>, %arg3: memref<8x32xf32, #tpu.memory_space<vmem>>, %arg4: memref<48x128xf32, #tpu.memory_space<vmem>>, %arg5: memref<1x128xf32, #tpu.memory_space<vmem>>, %arg6: memref<32x64xf32, #tpu.memory_space<vmem>>, %arg7: memref<1x64xf32, #tpu.memory_space<vmem>>, %arg8: memref<1x8x128xf32, #tpu.memory_space<vmem>>, %arg9: memref<8x32xf32, #tpu.memory_space<vmem>>, %arg10: memref<8x32xf32, #tpu.memory_space<vmem>>) attributes {dimension_semantics = [#tpu.dimension_semantics<arbitrary>], iteration_bounds = array<i64: 1>, scalar_prefetch = 0 : i64, scratch_operands = 2 : i64, tpu.core_type = #tpu.core_type<tc>, window_params = [{transform_indices = @transform_0, window_bounds = array<i64: 1, 8, 16>}, {pipeline_mode = #tpu.pipeline_mode<synchronous>, transform_indices = @transform_1, window_bounds = array<i64: 8, 32>}, {pipeline_mode = #tpu.pipeline_mode<synchronous>, transform_indices = @transform_2, window_bounds = array<i64: 8, 32>}, {pipeline_mode = #tpu.pipeline_mode<synchronous>, transform_indices = @transform_3, window_bounds = array<i64: 48, 128>}, {pipeline_mode = #tpu.pipeline_mode<synchronous>, transform_indices = @transform_4, window_bounds = array<i64: 1, 128>}, {pipeline_mode = #tpu.pipeline_mode<synchronous>, transform_indices = @transform_5, window_bounds = array<i64: 32, 64>}, {pipeline_mode = #tpu.pipeline_mode<synchronous>, transform_indices = @transform_6, window_bounds = array<i64: 1, 64>}, {transform_indices = @transform_7, window_bounds = array<i64: 1, 8, 128>}]} {
    %c0_i32 = arith.constant 0 : i32
    %0 = arith.cmpi eq, %arg0, %c0_i32 : i32
    %1 = arith.extui %0 : i1 to i32
    %c0_i32_0 = arith.constant 0 : i32
    %2 = arith.cmpi ne, %1, %c0_i32_0 : i32
    scf.if %2 {
      %c0_24 = arith.constant 0 : index
      %c0_25 = arith.constant 0 : index
      %39 = vector.load %arg2[%c0_24, %c0_25] : memref<8x32xf32, #tpu.memory_space<vmem>>, vector<8x32xf32>
      %c0_26 = arith.constant 0 : index
      %c0_27 = arith.constant 0 : index
      %40 = vector.load %arg9[%c0_26, %c0_27] : memref<8x32xf32, #tpu.memory_space<vmem>>, vector<8x32xf32>
      tpu.vector_store %arg9[%c0_26, %c0_27], %39 {strides = array<i32>} : memref<8x32xf32, #tpu.memory_space<vmem>>, vector<8x32xf32>,
      %c0_28 = arith.constant 0 : index
      %c0_29 = arith.constant 0 : index
      %41 = vector.load %arg3[%c0_28, %c0_29] : memref<8x32xf32, #tpu.memory_space<vmem>>, vector<8x32xf32>
      %c0_30 = arith.constant 0 : index
      %c0_31 = arith.constant 0 : index
      %42 = vector.load %arg10[%c0_30, %c0_31] : memref<8x32xf32, #tpu.memory_space<vmem>>, vector<8x32xf32>
      tpu.vector_store %arg10[%c0_30, %c0_31], %41 {strides = array<i32>} : memref<8x32xf32, #tpu.memory_space<vmem>>, vector<8x32xf32>,
    } else {
    }
    %c0 = arith.constant 0 : index
    %c0_1 = arith.constant 0 : index
    %3 = vector.load %arg9[%c0, %c0_1] : memref<8x32xf32, #tpu.memory_space<vmem>>, vector<8x32xf32>
    %c0_2 = arith.constant 0 : index
    %c0_3 = arith.constant 0 : index
    %4 = vector.load %arg10[%c0_2, %c0_3] : memref<8x32xf32, #tpu.memory_space<vmem>>, vector<8x32xf32>
    %c0_4 = arith.constant 0 : index
    %c0_5 = arith.constant 0 : index
    %c0_6 = arith.constant 0 : index
    %5 = vector.load %arg1[%c0_4, %c0_5, %c0_6] : memref<1x8x16xf32, #tpu.memory_space<vmem>>, vector<1x8x16xf32>
    %6 = vector.shape_cast %5 : vector<1x8x16xf32> to vector<8x16xf32>
    %7 = tpu.concatenate %6, %3 in 1 : vector<8x16xf32>, vector<8x32xf32> -> vector<8x48xf32>
    %c0_7 = arith.constant 0 : index
    %c0_8 = arith.constant 0 : index
    %8 = vector.load %arg4[%c0_7, %c0_8] : memref<48x128xf32, #tpu.memory_space<vmem>>, vector<48x128xf32>
    %cst = arith.constant dense<0.000000e+00> : vector<8x128xf32>
    %9 = tpu.matmul %7, %8, %cst {dimension_numbers = #tpu.dot_dimension_numbers<[1], [0], [0], [1], [0, 0, 1, 1], [], []>} : vector<8x48xf32>, vector<48x128xf32>, vector<8x128xf32> -> vector<8x128xf32>
    %c0_9 = arith.constant 0 : index
    %c0_10 = arith.constant 0 : index
    %10 = vector.load %arg5[%c0_9, %c0_10] : memref<1x128xf32, #tpu.memory_space<vmem>>, vector<1x128xf32>
    %11 = vector.broadcast %10 : vector<1x128xf32> to vector<8x128xf32>
    %12 = arith.addf %9, %11 : vector<8x128xf32>
    %13 = arith.negf %12 : vector<8x128xf32>
    %14 = math.exp %13 : vector<8x128xf32>
    %cst_11 = arith.constant 1.000000e+00 : f32
    %15 = vector.broadcast %cst_11 : f32 to vector<8x128xf32>
    %16 = arith.addf %15, %14 : vector<8x128xf32>
    %17 = arith.divf %15, %16 : vector<8x128xf32>
    %18 = math.tanh %12 : vector<8x128xf32>
    %19 = vector.extract_strided_slice %17 {offsets = [0, 0], sizes = [8, 32], strides = [1, 1]} : vector<8x128xf32> to vector<8x32xf32>
    %20 = vector.extract_strided_slice %17 {offsets = [0, 32], sizes = [8, 32], strides = [1, 1]} : vector<8x128xf32> to vector<8x32xf32>
    %21 = vector.extract_strided_slice %18 {offsets = [0, 64], sizes = [8, 32], strides = [1, 1]} : vector<8x128xf32> to vector<8x32xf32>
    %22 = vector.extract_strided_slice %17 {offsets = [0, 96], sizes = [8, 32], strides = [1, 1]} : vector<8x128xf32> to vector<8x32xf32>
    %23 = arith.mulf %20, %4 : vector<8x32xf32>
    %24 = arith.mulf %19, %21 : vector<8x32xf32>
    %25 = arith.addf %23, %24 : vector<8x32xf32>
    %26 = math.tanh %25 : vector<8x32xf32>
    %27 = arith.mulf %22, %26 : vector<8x32xf32>
    %c0_12 = arith.constant 0 : index
    %c0_13 = arith.constant 0 : index
    %28 = vector.load %arg9[%c0_12, %c0_13] : memref<8x32xf32, #tpu.memory_space<vmem>>, vector<8x32xf32>
    tpu.vector_store %arg9[%c0_12, %c0_13], %27 {strides = array<i32>} : memref<8x32xf32, #tpu.memory_space<vmem>>, vector<8x32xf32>,
    %c0_14 = arith.constant 0 : index
    %c0_15 = arith.constant 0 : index
    %29 = vector.load %arg10[%c0_14, %c0_15] : memref<8x32xf32, #tpu.memory_space<vmem>>, vector<8x32xf32>
    tpu.vector_store %arg10[%c0_14, %c0_15], %25 {strides = array<i32>} : memref<8x32xf32, #tpu.memory_space<vmem>>, vector<8x32xf32>,
    %c0_16 = arith.constant 0 : index
    %c0_17 = arith.constant 0 : index
    %30 = vector.load %arg6[%c0_16, %c0_17] : memref<32x64xf32, #tpu.memory_space<vmem>>, vector<32x64xf32>
    %cst_18 = arith.constant dense<0.000000e+00> : vector<8x64xf32>
    %31 = tpu.matmul %27, %30, %cst_18 {dimension_numbers = #tpu.dot_dimension_numbers<[1], [0], [0], [1], [0, 0, 1, 1], [], []>} : vector<8x32xf32>, vector<32x64xf32>, vector<8x64xf32> -> vector<8x64xf32>
    %c0_19 = arith.constant 0 : index
    %c0_20 = arith.constant 0 : index
    %32 = vector.load %arg7[%c0_19, %c0_20] : memref<1x64xf32, #tpu.memory_space<vmem>>, vector<1x64xf32>
    %33 = vector.broadcast %32 : vector<1x64xf32> to vector<8x64xf32>
    %34 = arith.addf %31, %33 : vector<8x64xf32>
    %35 = tpu.concatenate %34, %27, %25 in 1 : vector<8x64xf32>, vector<8x32xf32>, vector<8x32xf32> -> vector<8x128xf32>
    %c0_21 = arith.constant 0 : index
    %c0_22 = arith.constant 0 : index
    %c0_23 = arith.constant 0 : index
    %36 = vector.load %arg8[%c0_21, %c0_22, %c0_23] : memref<1x8x128xf32, #tpu.memory_space<vmem>>, vector<1x8x128xf32>
    %37 = vector.shape_cast %36 : vector<1x8x128xf32> to vector<8x128xf32>
    %38 = vector.shape_cast %35 : vector<8x128xf32> to vector<1x8x128xf32>
    tpu.vector_store %arg8[%c0_21, %c0_22, %c0_23], %38 {strides = array<i32>} : memref<1x8x128xf32, #tpu.memory_space<vmem>>, vector<1x8x128xf32>,
    return
  }
  func.func @transform_0(%arg0: i32) -> (i32, i32, i32) {
    %c0_i32 = arith.constant 0 : i32
    %c0_i32_0 = arith.constant 0 : i32
    %c0_i32_1 = arith.constant 0 : i32
    return %arg0, %c0_i32, %c0_i32_0 : i32, i32, i32
  }
  func.func @transform_1(%arg0: i32) -> (i32, i32) {
    %c0_i32 = arith.constant 0 : i32
    %c0_i32_0 = arith.constant 0 : i32
    %c0_i32_1 = arith.constant 0 : i32
    return %c0_i32, %c0_i32_0 : i32, i32
  }
  func.func @transform_2(%arg0: i32) -> (i32, i32) {
    %c0_i32 = arith.constant 0 : i32
    %c0_i32_0 = arith.constant 0 : i32
    %c0_i32_1 = arith.constant 0 : i32
    return %c0_i32, %c0_i32_0 : i32, i32
  }
  func.func @transform_3(%arg0: i32) -> (i32, i32) {
    %c0_i32 = arith.constant 0 : i32
    %c0_i32_0 = arith.constant 0 : i32
    %c0_i32_1 = arith.constant 0 : i32
    return %c0_i32, %c0_i32_0 : i32, i32
  }
  func.func @transform_4(%arg0: i32) -> (i32, i32) {
    %c0_i32 = arith.constant 0 : i32
    %c0_i32_0 = arith.constant 0 : i32
    %c0_i32_1 = arith.constant 0 : i32
    return %c0_i32, %c0_i32_0 : i32, i32
  }
  func.func @transform_5(%arg0: i32) -> (i32, i32) {
    %c0_i32 = arith.constant 0 : i32
    %c0_i32_0 = arith.constant 0 : i32
    %c0_i32_1 = arith.constant 0 : i32
    return %c0_i32, %c0_i32_0 : i32, i32
  }
  func.func @transform_6(%arg0: i32) -> (i32, i32) {
    %c0_i32 = arith.constant 0 : i32
    %c0_i32_0 = arith.constant 0 : i32
    %c0_i32_1 = arith.constant 0 : i32
    return %c0_i32, %c0_i32_0 : i32, i32
  }
  func.func @transform_7(%arg0: i32) -> (i32, i32, i32) {
    %c0_i32 = arith.constant 0 : i32
    %c0_i32_0 = arith.constant 0 : i32
    %c0_i32_1 = arith.constant 0 : i32
    return %arg0, %c0_i32, %c0_i32_0 : i32, i32, i32
  }
}

</mosaic_0001>

<bundles_post_ra>
// kernel: tpu_custom_call.1
= control target key start
LH: loop header
LB: loop body
LE: loop exit
PB: predicated region body
PF: predicated region fallthrough
CT: control target
= control target key end

     0   :  { %12 = vsyncpa [#allocation5], 0  ;;  %s727_s0 = inlined_call_operand.hbm [shape: f32[1,8,16], index: 0, kind: input, shape index: {}]   ;;  %s728_s1 = inlined_call_operand.hbm [shape: f32[8,32], index: 1, kind: input, shape index: {}]   ;;  %s729_s2 = inlined_call_operand.hbm [shape: f32[8,32], index: 2, kind: input, shape index: {}]   ;;  %s730_s3 = inlined_call_operand.hbm [shape: f32[48,128], index: 3, kind: input, shape index: {}]   ;;  %s731_s4 = inlined_call_operand.vmem [shape: f32[1,128], index: 4, kind: input, shape index: {}]   ;;  %s732_s5 = inlined_call_operand.hbm [shape: f32[32,64], index: 5, kind: input, shape index: {}]   ;;  %s733_s6 = inlined_call_operand.vmem [shape: f32[1,64], index: 6, kind: input, shape index: {}]   ;;  %s734_s7 = inlined_call_operand.hbm [shape: f32[1,8,128], index: 7, kind: output, shape index: {}]  }
   0x1   :  { %13 = vsyncpa [#allocation8], 0 }
   0x2   :  { %14 = vsyncpa [#allocation11], 0 }
   0x3   :  { %15 = vsyncpa [#allocation6], 0  ;;  %s565_s24 = smov [#allocation7]   ;;  %s566_s26 = smov [#allocation10]  }
   0x4   :  { %s32_s25 = sshll.u32 %s565_s24, 4  ;;  %s51_s27 = sshll.u32 %s566_s26, 4  ;;  %s33_s25 = int_to_ptr.vmem [resolvable:$true] %s32_s25  ;;  %s620_s27 = int_to_ptr.vmem [resolvable:$true] %s51_s27 }
   0x5   :  { %s425_s30 = scalar_lea.hbm %s728_s1, 128 }
   0x6   :  { %p426_p0 = scmp.ne.s32.totalorder %s728_s1, %s425_s30  ;;  %p429_p1 = scmp.lt.u32.totalorder %s425_s30, %s728_s1 }
   0x8   :  { %p431_p2 = pnand %p429_p1, %p426_p0 }
   0xa   :  { %434 = shalt.err (!%p431_p2)
}
   0xb   :  { %s435_s12 = scalar_lea.vmem %s33_s25, 128  ;;  %p440_p4 = scmp.lt.s32.totalorder %s33_s25, %s33_s25 }
   0xc   :  { %p436_p3 = scmp.ne.s32.totalorder %s33_s25, %s435_s12  ;;  %p441_p5 = scmp.lt.s32.totalorder %s435_s12, %s435_s12 }
   0xe   :  { %p442_p6 = por %p441_p5, %p440_p4 }
  0x10   :  { %p443_p7 = pnand %p442_p6, %p436_p3 }
  0x12   :  { %446 = shalt.err (!%p443_p7)
}
  0x13   :  { %35 = dma.hbm_to_vmem [thread:$0]  %s728_s1, 128, %s33_s25, [#allocation8]  }
  0x14   :  { %s447_s17 = scalar_lea.hbm %s730_s3, 768 }
  0x15   :  { %p448_p8 = scmp.ne.s32.totalorder %s730_s3, %s447_s17  ;;  %p451_p9 = scmp.lt.u32.totalorder %s447_s17, %s730_s3 }
  0x17   :  { %p453_p10 = pnand %p451_p9, %p448_p8 }
  0x19   :  { %456 = shalt.err (!%p453_p10)
}
  0x1a   :  { %s457_s22 = scalar_lea.vmem %s620_s27, 768  ;;  %p462_p12 = scmp.lt.s32.totalorder %s620_s27, %s620_s27 }
  0x1b   :  { %p458_p11 = scmp.ne.s32.totalorder %s620_s27, %s457_s22  ;;  %p463_p13 = scmp.lt.s32.totalorder %s457_s22, %s457_s22 }
  0x1d   :  { %p464_p0 = por %p463_p13, %p462_p12 }
  0x1f   :  { %p465_p1 = pnand %p464_p0, %p458_p11 }
  0x21   :  { %468 = shalt.err (!%p465_p1)
}
  0x22   :  { %s567_s1 = smov 128   ;;  %s568_s23 = smov 8  }
  0x23   :  { %57 = dma.hbm_to_vmem [thread:$0]  %s730_s3, 768, %s620_s27, [#allocation11], %s567_s1, %s567_s1, %s568_s23  }
  0x24   :  { %s569_s26 = smov [#allocation4]   ;;  %s570_s29 = smov [#allocation9]  }
  0x25   :  { %s22_s28 = sshll.u32 %s569_s26, 4  ;;  %s42_s30 = sshll.u32 %s570_s29, 4  ;;  %s23_s28 = int_to_ptr.vmem [resolvable:$true] %s22_s28  ;;  %s43_s30 = int_to_ptr.vmem [resolvable:$true] %s42_s30 }
  0x26   :  { %s469_s10 = scalar_lea.hbm %s727_s0, 128 }
  0x27   :  { %p470_p2 = scmp.ne.s32.totalorder %s727_s0, %s469_s10  ;;  %p473_p3 = scmp.lt.u32.totalorder %s469_s10, %s727_s0 }
  0x29   :  { %p475_p4 = pnand %p473_p3, %p470_p2 }
  0x2b   :  { %478 = shalt.err (!%p475_p4)
}
  0x2c   :  { %s479_s3 = scalar_lea.vmem %s23_s28, 128  ;;  %p484_p6 = scmp.lt.s32.totalorder %s23_s28, %s23_s28 }
  0x2d   :  { %p480_p5 = scmp.ne.s32.totalorder %s23_s28, %s479_s3  ;;  %p485_p7 = scmp.lt.s32.totalorder %s479_s3, %s479_s3 }
  0x2f   :  { %p486_p8 = por %p485_p7, %p484_p6 }
  0x31   :  { %p487_p9 = pnand %p486_p8, %p480_p5 }
  0x33   :  { %490 = shalt.err (!%p487_p9)
}
  0x34   :  { %25 = dma.hbm_to_vmem [thread:$0]  %s727_s0, 128, %s23_s28, [#allocation5]  }
  0x35   :  { %s491_s18 = scalar_lea.hbm %s729_s2, 128 }
  0x36   :  { %p492_p10 = scmp.ne.s32.totalorder %s729_s2, %s491_s18  ;;  %p495_p11 = scmp.lt.u32.totalorder %s491_s18, %s729_s2 }
  0x38   :  { %p497_p12 = pnand %p495_p11, %p492_p10 }
  0x3a   :  { %500 = shalt.err (!%p497_p12)
}
  0x3b   :  { %s501_s24 = scalar_lea.vmem %s43_s30, 128  ;;  %p506_p0 = scmp.lt.s32.totalorder %s43_s30, %s43_s30 }
  0x3c   :  { %p502_p13 = scmp.ne.s32.totalorder %s43_s30, %s501_s24  ;;  %p507_p1 = scmp.lt.s32.totalorder %s501_s24, %s501_s24 }
  0x3e   :  { %p508_p2 = por %p507_p1, %p506_p0 }
  0x40   :  { %p509_p3 = pnand %p508_p2, %p502_p13 }
  0x42   :  { %512 = shalt.err (!%p509_p3)
}
  0x43   :  { %45 = dma.hbm_to_vmem [thread:$0]  %s729_s2, 128, %s43_s30, [#allocation8]  }
  0x44   :  { %s571_s26 = smov [#allocation12]   ;;  %s513_s9 = scalar_lea.hbm %s732_s5, 512 }
  0x45   :  { %s65_s28 = sshll.u32 %s571_s26, 4  ;;  %p514_p4 = scmp.ne.s32.totalorder %s732_s5, %s513_s9  ;;  %s66_s28 = int_to_ptr.vmem [resolvable:$true] %s65_s28 }
  0x46   :  { %p517_p5 = scmp.lt.u32.totalorder %s513_s9, %s732_s5 }
  0x48   :  { %p519_p6 = pnand %p517_p5, %p514_p4 }
  0x4a   :  { %522 = shalt.err (!%p519_p6)
}
  0x4b   :  { %s523_s14 = scalar_lea.vmem %s66_s28, 512  ;;  %p528_p8 = scmp.lt.s32.totalorder %s66_s28, %s66_s28 }
  0x4c   :  { %p524_p7 = scmp.ne.s32.totalorder %s66_s28, %s523_s14  ;;  %p529_p9 = scmp.lt.s32.totalorder %s523_s14, %s523_s14 }
  0x4e   :  { %p530_p10 = por %p529_p9, %p528_p8 }
  0x50   :  { %p531_p11 = pnand %p530_p10, %p524_p7 }
  0x52   :  { %534 = shalt.err (!%p531_p11)
}
  0x53   :  { %71 = dma.hbm_to_vmem [thread:$0]  %s732_s5, 512, %s66_s28, [#allocation11], %s567_s1, %s567_s1, %s568_s23  }
  0x54   :  { %557 = dma.done.wait [#allocation5], 128  }
  0x55   :  { %558 = vsyncadd [#allocation5], 4294967168 }
  0x56   :  { %559 = dma.done.wait [#allocation8], 256  }
  0x57   :  { %560 = vsyncadd [#allocation8], 4294967040 }
  0x58   :  { %561 = dma.done.wait [#allocation11], 1280  }
  0x59   :  { %562 = vsyncadd [#allocation11], 4294966016  ;;  %v572_v0 = vmov 0.0|0.0   ;;  %vm573_vm0 = vmmov 0   ;;  %v574_v1 = vmov 0.0   ;;  %vm94_vm1 = vcmask 261120  }
  0x5a   :  { %387 = vmatprep.subr.bf16.mxu0 %v572_v0  ;;  %396 = vmatprep.subr.bf16.mxu1 %v572_v0  ;;  %v93_v2 = vld [vmem:[#allocation7] sm:$0xff]  ;;  %v107_v3 = vld [vmem:[#allocation10] sm:$0xff]  ;;  %v108_v4 = vld [vmem:[#allocation10 + $0x8] sm:$0xff]  ;;  %s575_s5 = smov 16   ;;  %s576_s1 = smov 32   ;;  %vm105_vm2 = vcmask 130048  }
  0x5b   :  { %373 = vmatprep.mubr.msk.f32.mxu0 %vm573_vm0, %v574_v1  ;;  %384 = vmatprep.mubr.msk.f32.mxu1 %vm573_vm0, %v574_v1  ;;  %95 = vst.msk [vmem:[#allocation2] sm:$0xff] %vm94_vm1, %v93_v2  ;;  %v388_v5 = vpack.c.bf16 %v108_v4, %v107_v3  ;;  %v109_v6 = vld [vmem:[#allocation10 + $0x10] sm:$0xff]  ;;  %v110_v7 = vld [vmem:[#allocation10 + $0x18] sm:$0xff]  ;;  %v111_v10 = vld [vmem:[#allocation10 + $0x20] sm:$0xff]  ;;  %vm120_vm3 = vcmask 392192   ;;  %s577_s27 = smov 64  }
  0x5c   :  { %v96_v8 = vld [vmem:[#allocation9] sm:$0xff]  ;;  %v391_v9 = vpack.c.bf16 %v110_v7, %v109_v6  ;;  %v112_v11 = vld [vmem:[#allocation10 + $0x28] sm:$0xff]  ;;  %v233_v33 = vld [vmem:[#allocation12] sm:$0xff]  ;;  %vm322_vm4 = vcmask 523264   ;;  %s579_s17 = smov [#allocation13]   ;;  %vm324_vm5 = vcmask 785408  }
  0x5d   :  { %389 = vmatpush3.bf16.msra.mxu0 %v388_v5  ;;  %97 = vst.msk [vmem:[#allocation3] sm:$0xff] %vm94_vm1, %v96_v8  ;;  %v394_v12 = vpack.c.bf16 %v112_v11, %v111_v10  ;;  %v100_v15 = vld [vmem:[#allocation4] sm:$0xff]  ;;  %v344_v18 = vld [vmem:[%s731_s4] ss:$0 sm:$0xff]  ;;  %v235_v35 = vld [vmem:[#allocation12 + $0x10] sm:$0xff]  ;;  %s578_s4 = smov 96  }
  0x5e   :  { %390 = vmatprep.subr.bf16.mxu0 %v572_v0  ;;  %v234_v34 = vld [vmem:[#allocation12 + $0x8] sm:$0xff]  ;;  %v236_v37 = vld [vmem:[#allocation12 + $0x18] sm:$0xff]  ;;  %s333_s18 = sshll.u32 %s579_s17, 4  ;;  %s334_s18 = int_to_ptr.vmem [resolvable:$true] %s333_s18 }
  0x5f   :  { %v397_v36 = vpack.c.bf16 %v234_v34, %v233_v33  ;;  %v400_v38 = vpack.c.bf16 %v236_v37, %v235_v35  ;;  %v347_v45 = vld [vmem:[%s733_s6] ss:$0 sm:$0xff]  ;;  %s535_s19 = scalar_lea.vmem %s334_s18, 128  ;;  %p540_p13 = scmp.lt.s32.totalorder %s334_s18, %s334_s18 }
  0x60   :  { %p536_p12 = scmp.ne.s32.totalorder %s334_s18, %s535_s19  ;;  %p541_p0 = scmp.lt.s32.totalorder %s535_s19, %s535_s19 }
  0x61   :  { %392 = vmatpush3.bf16.msra.mxu0 %v391_v9  ;;  %398 = vmatpush3.bf16.msra.mxu1 %v397_v36 }
  0x62   :  { %v98_v13 = vld [vmem:[#allocation2] sm:$0xff]  ;;  %393 = vmatprep.subr.bf16.mxu0 %v572_v0  ;;  %399 = vmatprep.subr.bf16.mxu1 %v572_v0  ;;  %p542_p1 = por %p541_p0, %p540_p13 }
  0x63   :  { %102 = vrot.lane.b32.xlu0 %v98_v13, %s575_s5 }
  0x64   :  { %v99_v14 = vld [vmem:[#allocation3] sm:$0xff]  ;;  %p543_p2 = pnand %p542_p1, %p536_p12 }
  0x65   :  { %395 = vmatpush3.bf16.msra.mxu0 %v394_v12  ;;  %202 = vrot.lane.b32.xlu1 %v99_v14, %s576_s1 }
  0x66   :  { %401 = vmatpush3.bf16.msra.mxu1 %v400_v38 }
  0xd5   :  { %v103_v16 = vpop.permute.xlu0 %102 }
  0xd6   :  { %v106_v17 = vsel %vm105_vm2, %v100_v15, %v103_v16 }
  0xd7   :  { %374 = vmatmul.mubr.msk.f32.vlgmr.msra.gmra.mrb[0].mxu0 %vm120_vm3, %v106_v17  ;;  %v203_v29 = vpop.permute.xlu1 %202 }
 0x1aa   :  { %v190_v19 = vpop.f32.mrb[0].mxu0 }
 0x1ab   :  { %v191_v20 = vadd.f32 %v344_v18, %v190_v19  ;;  %v375_v21 = vpop.f32.mrb[1].mxu0 }
 0x1ad   :  { %417 = vtanh.f32 %v191_v20  ;;  %v346_v23 = vmul.f32 -1.442695, %v191_v20 }
 0x1af   :  { %419 = vpow2.f32 %v346_v23 }
 0x1b7   :  { %v418_v22 = vpop.eup %417 }
 0x1b8   :  { %207 = vrot.lane.b32.xlu0 %v418_v22, %s577_s27 }
 0x1b9   :  { %v420_v24 = vpop.eup %419 }
 0x1ba   :  { %v197_v25 = vadd.f32 1.0, %v420_v24 }
 0x1bc   :  { %421 = vrcp.f32 %v197_v25 }
 0x1c6   :  { %v422_v26 = vpop.eup %421 }
 0x1c7   :  { %v205_v30 = vmul.f32 %v422_v26, %v203_v29 }
 0x22a   :  { %v208_v27 = vpop.permute.xlu0 %207 }
 0x22b   :  { %v210_v28 = vmul.f32 %v422_v26, %v208_v27 }
 0x22d   :  { %212 = vrot.lane.b32.xlu1 %v210_v28, %s576_s1 }
 0x29f   :  { %v213_v31 = vpop.permute.xlu1 %212 }
 0x2a0   :  { %v215_v32 = vadd.f32 %v213_v31, %v205_v30 }
 0x2a2   :  { %423 = vtanh.f32 %v215_v32 }
 0x2ac   :  { %v424_v39 = vpop.eup %423 }
 0x2ad   :  { %218 = vrot.lane.b32.xlu0 %v424_v39, %s577_s27 }
 0x31f   :  { %v219_v40 = vpop.permute.xlu0 %218 }
 0x320   :  { %v221_v41 = vmul.f32 %v422_v26, %v219_v40 }
 0x322   :  { %316 = vrot.lane.b32.xlu0 %v221_v41, %s578_s4  ;;  %223 = vrot.lane.b32.xlu1 %v221_v41, %s576_s1 }
 0x326   :  { %229 = vrot.lane.b32.xlu0 %v215_v32, %s578_s4  ;;  %319 = vrot.lane.b32.xlu1 %v215_v32, %s577_s27 }
 0x394   :  { %v317_v42 = vpop.permute.xlu0 %316  ;;  %v224_v43 = vpop.permute.xlu1 %223 }
 0x395   :  { %227 = vst.msk [vmem:[#allocation2] sm:$0xff] %vm94_vm1, %v224_v43  ;;  %385 = vmatmul.mubr.msk.f32.vlgmr.msra.gmra.mrb[0].mxu1 %vm94_vm1, %v224_v43 }
 0x398   :  { %v230_v44 = vpop.permute.xlu0 %229  ;;  %v320_v49 = vpop.permute.xlu1 %319 }
 0x399   :  { %232 = vst.msk [vmem:[#allocation3] sm:$0xff] %vm94_vm1, %v230_v44 }
 0x468   :  { %v312_v46 = vpop.f32.mrb[0].mxu1 }
 0x469   :  { %v313_v47 = vadd.f32 %v347_v45, %v312_v46  ;;  %v386_v48 = vpop.f32.mrb[1].mxu1 }
 0x46b   :  { %v323_v50 = vsel %vm322_vm4, %v313_v47, %v317_v42 }
 0x46c   :  { %v325_v51 = vsel %vm324_vm5, %v323_v50, %v320_v49 }
 0x46d   :  { %326 = vst [vmem:[#allocation13] sm:$0xff] %v325_v51 }
 0x46e   :  { %546 = shalt.err (!%p543_p2)
}
 0x46f   :  { %s547_s21 = scalar_lea.hbm %s734_s7, 128 }
 0x470   :  { %p548_p3 = scmp.ne.s32.totalorder %s734_s7, %s547_s21  ;;  %p551_p4 = scmp.lt.u32.totalorder %s547_s21, %s734_s7 }
 0x472   :  { %p553_p5 = pnand %p551_p4, %p548_p3 }
 0x474   :  { %556 = shalt.err (!%p553_p5)
}
 0x475   :  { %336 = dma.vmem_to_hbm [thread:$0]  %s334_s18, 128, %s734_s7, [#allocation6]  }
 0x476   :  { %563 = dma.done.wait [#allocation6], 128  }
 0x477   :  { %564 = vsyncadd [#allocation6], 4294967168 }
 0x478   :  { %340 = vsyncpa [#allocation5], 1 }
 0x479   :  { %341 = vsyncpa [#allocation8], 1 }
 0x47a   :  { %342 = vsyncpa [#allocation11], 1 }
 0x47b   :  { %343 = vsyncpa [#allocation6], 1 }

</bundles_post_ra>
